<compile_context>
chip_gen: v6e
topology: v6e:2x2x1
jax: 0.10.0
libtpu: 0.0.40
codegen_flags: <defaults>
</compile_context>

<pallas_src>
import functools

import jax
import jax.numpy as jnp
from jax.experimental import pallas as pl
from jax.experimental.pallas import tpu as pltpu

_SMALL_FAST_PATH_BYTES = 1 << 20    # below ~1 MiB of input, plain XLA wins


def _cdiv(a, b):
    return (a + b - 1) // b


def _next_pow2(x):
    return 1 if x <= 1 else 1 << (x - 1).bit_length()


def _round_up(x, m):
    return _cdiv(x, m) * m


def _vmem_budget_and_limit():
    """Generation-aware VMEM sizing (v5e/v6e: 128 MiB physical, v7x: 64 MiB)."""
    try:
        cap = int(pltpu.get_tpu_info().vmem_capacity_bytes)
    except Exception:
        cap = 64 * 1024 * 1024                     # conservative fallback (v7x per-TC)
    limit = min(cap // 2, 96 * 1024 * 1024)        # 32 MiB on v7x, 64 MiB on v5e/v6e
    budget = (limit * 3) // 4                      # headroom for scratch / out tiles
    return budget, limit


def _choose_tile_n(n, d, in_itemsize, budget):
    """Largest row tile whose double-buffered + f32-intermediate footprint fits."""
    # Native sublane pack: 8 rows (f32), 16 (bf16), 32 (int8/fp8).
    pack = max(8, 32 // max(int(in_itemsize), 1))
    # Per-row VMEM bytes: 2 inputs x 2 pipeline buffers in native dtype,
    # plus ~3 tile-sized f32 intermediates (upcast / diff / diff^2), plus y.
    per_row = 4 * d * in_itemsize + 3 * d * 4 + 16
    tile = 2048
    while tile > pack and tile * per_row > budget:
        tile //= 2
    tile = max(tile, pack)
    # Keep >= ~8 grid blocks when N permits so both v7x TCs get work and the
    # double-buffer pipeline has enough steps to overlap (neutral elsewhere).
    target = _round_up(_next_pow2(max(_cdiv(n, 8), 1)), pack)
    tile = min(tile, target)
    tile = min(tile, _round_up(n, pack))
    return max(tile, pack)


def _contrastive_loss_kernel(x0_ref, x1_ref, y_ref, out_ref, *, tau, n, tile_n):
    i = pl.program_id(0)

    # Upcast on the VPU after the (possibly bf16) VMEM load; hidden under DMA.
    x0 = x0_ref[...].astype(jnp.float32)
    x1 = x1_ref[...].astype(jnp.float32)

    diff = x0 - x1                                             # (tile_n, D) f32
    dist_pos = jnp.sum(diff * diff, axis=1, keepdims=True)     # (tile_n, 1)
    margin = jnp.maximum(tau - jnp.sqrt(dist_pos), 0.0)        # relu(tau - sqrt)
    dist_neg = margin * margin                                 # (tile_n, 1)

    y = y_ref[...].astype(jnp.float32)                         # (tile_n, 1)
    loss = (y * dist_pos + (1.0 - y) * dist_neg) * 0.5         # (tile_n, 1)

    # Mask rows past the true batch size (ragged last tile), then reduce the
    # whole block to a single scalar: 4 bytes of HBM writeback per block
    # instead of a lane-width-1 masked store stream.
    row = i * tile_n + jax.lax.broadcasted_iota(jnp.int32, (tile_n, 1), 0)
    loss = jnp.where(row < n, loss, 0.0)
    out_ref[...] = jnp.sum(loss, keepdims=True)                # (1, 1)


def _reference(x0, x1, y, tau):
    dist_pos = jnp.sum(jnp.square(x0 - x1), axis=1)
    dist_neg = jnp.square(jnp.maximum(tau - jnp.sqrt(dist_pos), 0.0))
    loss = (y * dist_pos + (1.0 - y) * dist_neg) * 0.5
    return jnp.mean(loss)


def contrastive_loss(x0, x1, y, tau: float, *, force_pallas: bool = False):
    """Pallas TPU implementation of ContrastiveLoss.forward."""
    n, d = x0.shape
    in_itemsize = jnp.dtype(x0.dtype).itemsize

    # Small-N fast path: launch/grid overhead dominates; fused XLA is faster.
    if not force_pallas and 2 * n * d * in_itemsize < _SMALL_FAST_PATH_BYTES:
        return _reference(x0.astype(jnp.float32), x1.astype(jnp.float32),
                          y.astype(jnp.float32), float(tau))

    budget, vmem_limit = _vmem_budget_and_limit()
    tile_n = _choose_tile_n(n, d, in_itemsize, budget)
    num_blocks = _cdiv(n, tile_n)

    y2 = y.reshape(n, 1).astype(jnp.float32)

    kernel = functools.partial(
        _contrastive_loss_kernel, tau=float(tau), n=n, tile_n=tile_n)

    cost = pl.CostEstimate(
        flops=3 * n * d + 10 * n,
        transcendentals=n,                       # one sqrt per row
        bytes_accessed=2 * n * d * in_itemsize + n * 4 + num_blocks * 4,
    )

    partial_sums = pl.pallas_call(
        kernel,
        out_shape=jax.ShapeDtypeStruct((num_blocks, 1), jnp.float32),
        grid=(num_blocks,),
        in_specs=[
            pl.BlockSpec((tile_n, d), lambda i: (i, 0)),   # x0 tile (native dtype)
            pl.BlockSpec((tile_n, d), lambda i: (i, 0)),   # x1 tile (native dtype)
            pl.BlockSpec((tile_n, 1), lambda i: (i, 0)),   # y column tile
        ],
        out_specs=pl.BlockSpec((1, 1), lambda i: (i, 0)),  # per-block partial sum
        compiler_params=pltpu.CompilerParams(
            dimension_semantics=("parallel",),   # independent blocks -> both TCs on v7x
            vmem_limit_bytes=int(vmem_limit),
        ),
        cost_estimate=cost,
    )(x0, x1, y2)

    # Tiny final reduction over num_blocks scalars; mean divides by true N.
    return jnp.sum(partial_sums) / jnp.float32(n)


if __name__ == "__main__":
    tau = 1.0                      # ContrastiveLoss(tau=1.0) — only hyperparameter
    key = jax.random.PRNGKey(0)
    k0, k1, k2 = jax.random.split(key, 3)

    # Small shapes implied by forward: x0, x1: (N, D), y: (N,)
    n, d = 8, 32
    x0 = jax.random.normal(k0, (n, d), dtype=jnp.float32)
    x1 = jax.random.normal(k1, (n, d), dtype=jnp.float32)
    y = jax.random.bernoulli(k2, 0.5, (n,)).astype(jnp.float32)

    # Force the Pallas path (small shapes would otherwise take the XLA fast path).
    out = jax.block_until_ready(contrastive_loss(x0, x1, y, tau, force_pallas=True))
    ref = _reference(x0, x1, y, tau)
    assert jnp.allclose(out, ref, rtol=1e-5, atol=1e-5), (out, ref)

    # Automatic small-N fast path gives the same answer.
    out_fast = jax.block_until_ready(contrastive_loss(x0, x1, y, tau))
    assert jnp.allclose(out_fast, ref, rtol=1e-5, atol=1e-5), (out_fast, ref)

    # Ragged batch: exercises the masked tail of the last tile.
    n2 = 13
    x0b = jax.random.normal(k0, (n2, d), dtype=jnp.float32)
    x1b = jax.random.normal(k1, (n2, d), dtype=jnp.float32)
    yb = jax.random.bernoulli(k2, 0.5, (n2,)).astype(jnp.float32)
    out2 = jax.block_until_ready(contrastive_loss(x0b, x1b, yb, tau, force_pallas=True))
    ref2 = _reference(x0b, x1b, yb, tau)
    assert jnp.allclose(out2, ref2, rtol=1e-5, atol=1e-5), (out2, ref2)

    # bf16 inputs travel as bf16 (half the HBM traffic); kernel upcasts in VMEM.
    x0c = x0.astype(jnp.bfloat16)
    x1c = x1.astype(jnp.bfloat16)
    out3 = jax.block_until_ready(contrastive_loss(x0c, x1c, y, tau, force_pallas=True))
    ref3 = _reference(x0c.astype(jnp.float32), x1c.astype(jnp.float32), y, tau)
    assert jnp.allclose(out3, ref3, rtol=1e-4, atol=1e-5), (out3, ref3)

    # Multi-block bf16 case with a ragged tail: exercises the capped tile size,
    # the parallel grid and the per-block in-kernel reduction.
    n3, d3 = 300, 160
    k3, k4, k5 = jax.random.split(jax.random.PRNGKey(0), 3)
    x0d = jax.random.normal(k3, (n3, d3), dtype=jnp.bfloat16)
    x1d = jax.random.normal(k4, (n3, d3), dtype=jnp.bfloat16)
    yd = jax.random.bernoulli(k5, 0.5, (n3,)).astype(jnp.float32)
    out4 = jax.block_until_ready(contrastive_loss(x0d, x1d, yd, tau, force_pallas=True))
    ref4 = _reference(x0d.astype(jnp.float32), x1d.astype(jnp.float32), yd, tau)
    assert jnp.allclose(out4, ref4, rtol=1e-4, atol=1e-5), (out4, ref4)

    print("KERNEL_OK")
</pallas_src>

<mosaic_0001>
module attributes {stable_mosaic.version = 11 : i64} {
  func.func @_contrastive_loss_kernel(%arg0: i32, %arg1: memref<8x32xf32, #tpu.memory_space<vmem>>, %arg2: memref<8x32xf32, #tpu.memory_space<vmem>>, %arg3: memref<8x1xf32, #tpu.memory_space<vmem>>, %arg4: memref<1x1xf32, #tpu.memory_space<vmem>>) attributes {dimension_semantics = [#tpu.dimension_semantics<parallel>], iteration_bounds = array<i64: 1>, scalar_prefetch = 0 : i64, scratch_operands = 0 : i64, tpu.core_type = #tpu.core_type<tc>, window_params = [{transform_indices = @transform_0, window_bounds = array<i64: 8, 32>}, {transform_indices = @transform_1, window_bounds = array<i64: 8, 32>}, {transform_indices = @transform_2, window_bounds = array<i64: 8, 1>}, {transform_indices = @transform_3, window_bounds = array<i64: 1, 1>}]} {
    %c0 = arith.constant 0 : index
    %c0_0 = arith.constant 0 : index
    %0 = vector.load %arg1[%c0, %c0_0] : memref<8x32xf32, #tpu.memory_space<vmem>>, vector<8x32xf32>
    %c0_1 = arith.constant 0 : index
    %c0_2 = arith.constant 0 : index
    %1 = vector.load %arg2[%c0_1, %c0_2] : memref<8x32xf32, #tpu.memory_space<vmem>>, vector<8x32xf32>
    %2 = arith.subf %0, %1 : vector<8x32xf32>
    %3 = arith.mulf %2, %2 : vector<8x32xf32>
    %cst = arith.constant dense<0.000000e+00> : vector<8xf32>
    %4 = vector.multi_reduction <add>, %3, %cst [1] : vector<8x32xf32> to vector<8xf32>
    %5 = vector.shape_cast %4 : vector<8xf32> to vector<8x1xf32>
    %6 = math.sqrt %5 : vector<8x1xf32>
    %cst_3 = arith.constant 1.000000e+00 : f32
    %7 = vector.broadcast %cst_3 : f32 to vector<8x1xf32>
    %8 = arith.subf %7, %6 : vector<8x1xf32>
    %cst_4 = arith.constant 0.000000e+00 : f32
    %9 = vector.broadcast %cst_4 : f32 to vector<8x1xf32>
    %10 = arith.maximumf %8, %9 : vector<8x1xf32>
    %11 = arith.mulf %10, %10 : vector<8x1xf32>
    %c0_5 = arith.constant 0 : index
    %c0_6 = arith.constant 0 : index
    %12 = vector.load %arg3[%c0_5, %c0_6] : memref<8x1xf32, #tpu.memory_space<vmem>>, vector<8x1xf32>
    %13 = arith.mulf %12, %5 : vector<8x1xf32>
    %cst_7 = arith.constant 1.000000e+00 : f32
    %14 = vector.broadcast %cst_7 : f32 to vector<8x1xf32>
    %15 = arith.subf %14, %12 : vector<8x1xf32>
    %16 = arith.mulf %15, %11 : vector<8x1xf32>
    %17 = arith.addf %13, %16 : vector<8x1xf32>
    %cst_8 = arith.constant 5.000000e-01 : f32
    %18 = vector.broadcast %cst_8 : f32 to vector<8x1xf32>
    %19 = arith.mulf %17, %18 : vector<8x1xf32>
    %c8_i32 = arith.constant 8 : i32
    %20 = arith.muli %arg0, %c8_i32 : i32
    %21 = tpu.iota {dimensions = array<i32: 0>} : vector<8x1xi32>
    %22 = vector.broadcast %20 : i32 to vector<8x1xi32>
    %23 = arith.addi %22, %21 : vector<8x1xi32>
    %c8_i32_9 = arith.constant 8 : i32
    %24 = vector.broadcast %c8_i32_9 : i32 to vector<8x1xi32>
    %25 = arith.cmpi slt, %23, %24 : vector<8x1xi32>
    %cst_10 = arith.constant 0.000000e+00 : f32
    %26 = vector.broadcast %cst_10 : f32 to vector<8x1xf32>
    %27 = arith.select %25, %19, %26 : vector<8x1xi1>, vector<8x1xf32>
    %28 = vector.shape_cast %27 : vector<8x1xf32> to vector<1x8x1xf32>
    %cst_11 = arith.constant dense<0.000000e+00> : vector<1xf32>
    %29 = vector.multi_reduction <add>, %28, %cst_11 [1, 2] : vector<1x8x1xf32> to vector<1xf32>
    %30 = vector.shape_cast %29 : vector<1xf32> to vector<1x1x1xf32>
    %31 = vector.extract %30[0, 0, 0] : f32 from vector<1x1x1xf32>
    %32 = vector.broadcast %31 : f32 to vector<1x1xf32>
    %c0_12 = arith.constant 0 : index
    %c0_13 = arith.constant 0 : index
    %33 = vector.load %arg4[%c0_12, %c0_13] : memref<1x1xf32, #tpu.memory_space<vmem>>, vector<1x1xf32>
    tpu.vector_store %arg4[%c0_12, %c0_13], %32 {strides = array<i32>} : memref<1x1xf32, #tpu.memory_space<vmem>>, vector<1x1xf32>,
    return
  }
  func.func @transform_0(%arg0: i32) -> (i32, i32) {
    %c0_i32 = arith.constant 0 : i32
    %c0_i32_0 = arith.constant 0 : i32
    return %arg0, %c0_i32 : i32, i32
  }
  func.func @transform_1(%arg0: i32) -> (i32, i32) {
    %c0_i32 = arith.constant 0 : i32
    %c0_i32_0 = arith.constant 0 : i32
    return %arg0, %c0_i32 : i32, i32
  }
  func.func @transform_2(%arg0: i32) -> (i32, i32) {
    %c0_i32 = arith.constant 0 : i32
    %c0_i32_0 = arith.constant 0 : i32
    return %arg0, %c0_i32 : i32, i32
  }
  func.func @transform_3(%arg0: i32) -> (i32, i32) {
    %c0_i32 = arith.constant 0 : i32
    %c0_i32_0 = arith.constant 0 : i32
    return %arg0, %c0_i32 : i32, i32
  }
}

</mosaic_0001>

<bundles_post_ra>
// kernel: tpu_custom_call.1
= control target key start
LH: loop header
LB: loop body
LE: loop exit
PB: predicated region body
PF: predicated region fallthrough
CT: control target
= control target key end

     0   :  { %8 = vsyncpa [#allocation3], 0  ;;  %s171_s0 = inlined_call_operand.vmem [shape: f32[8,32], index: 0, kind: input, shape index: {}]   ;;  %s172_s1 = inlined_call_operand.hbm [shape: f32[8,32], index: 1, kind: input, shape index: {}]   ;;  %s173_s2 = inlined_call_operand.vmem [shape: f32[8,1], index: 2, kind: input, shape index: {}]   ;;  %s174_s3 = inlined_call_operand.hbm [shape: f32[1,1], index: 3, kind: output, shape index: {}]  }
   0x1   :  { %9 = vsyncpa [#allocation4], 0  ;;  %s137_s12 = smov [#allocation2]  }
   0x2   :  { %s18_s13 = sshll.u32 %s137_s12, 4  ;;  %s19_s13 = int_to_ptr.vmem [resolvable:$true] %s18_s13 }
   0x3   :  { %s101_s14 = scalar_lea.vmem %s19_s13, 128  ;;  %p106_p1 = scmp.lt.s32.totalorder %s19_s13, %s19_s13 }
   0x4   :  { %p102_p0 = scmp.ne.s32.totalorder %s19_s13, %s101_s14  ;;  %p107_p2 = scmp.lt.s32.totalorder %s101_s14, %s101_s14 }
   0x6   :  { %p108_p3 = por %p107_p2, %p106_p1 }
   0x8   :  { %p109_p4 = pnand %p108_p3, %p102_p0 }
   0xa   :  { %112 = shalt.err (!%p109_p4)
}
   0xb   :  { %21 = dma.hbm_to_vmem [thread:$0]  %s172_s1, 128, %s19_s13, [#allocation3]  }
   0xc   :  { %133 = dma.done.wait [#allocation3], 128  }
   0xd   :  { %134 = vsyncadd [#allocation3], 4294967168  ;;  %v27_v0 = vld [vmem:[%s171_s0] sm:$0xff]  ;;  %vm31_vm0 = vcmask 261120   ;;  %vm58_vm3 = vcmask 7168   ;;  %s138_s0 = smov [#allocation5]  }
   0xe   :  { %v28_v1 = vld [vmem:[#allocation2] sm:$0xff]  ;;  %vm70_vm4 = vcmask 0  }
   0xf   :  { %v29_v2 = vsub.f32 %v27_v0, %v28_v1  ;;  %v45_v12 = vld [vmem:[%s173_s2] sm:$0xff]  ;;  %s78_s2 = sshll.u32 %s138_s0, 4  ;;  %s79_s2 = int_to_ptr.vmem [resolvable:$true] %s78_s2 }
  0x10   :  { %v47_v14 = vsub.f32 1.0, %v45_v12  ;;  %s113_s21 = scalar_lea.vmem %s79_s2, 16  ;;  %s117_s22 = scalar_lea.vmem %s79_s2, 32 }
  0x11   :  { %v30_v3 = vmul.f32 %v29_v2, %v29_v2  ;;  %p114_p5 = scmp.ne.s32.totalorder %s79_s2, %s113_s21  ;;  %p118_p6 = scmp.lt.s32.totalorder %s79_s2, %s79_s2 }
  0x12   :  { %p119_p7 = scmp.lt.s32.totalorder %s117_s22, %s113_s21 }
  0x13   :  { %v32_v4 = vsel %vm31_vm0, %v30_v3, 0.0 }
  0x14   :  { %33 = vadd.xlane.f32.xlu0 %v32_v4  ;;  %p120_p8 = por %p119_p7, %p118_p6 }
  0x16   :  { %p121_p9 = pnand %p120_p8, %p114_p5 }
  0x9d   :  { %v34_v5 = vpop.xlane.xlu0 %33 }
  0x9e   :  { %91 = vrsqrt.f32 %v34_v5  ;;  %vm37_vm1 = vcmp.eq.f32.partialorder %v34_v5, inf  ;;  %v40_v8 = vand.u32 2147483648, %v34_v5  ;;  %vm39_vm2 = vcmp.eq.f32.partialorder %v34_v5, 0.0 }
  0x9f   :  { %v46_v16 = vmul.f32 %v45_v12, %v34_v5 }
  0xab   :  { %v92_v6 = vpop.eup %91 }
  0xac   :  { %v36_v7 = vmul.f32 %v92_v6, %v34_v5 }
  0xae   :  { %v38_v9 = vsel %vm37_vm1, %v34_v5, %v36_v7 }
  0xaf   :  { %v41_v10 = vsel %vm39_vm2, %v40_v8, %v38_v9 }
  0xb0   :  { %v42_v11 = vsub.f32 1.0, %v41_v10 }
  0xb2   :  { %v43_v13 = vmax.f32 %v42_v11, 0.0 }
  0xb4   :  { %v44_v15 = vmul.f32 %v43_v13, %v43_v13 }
  0xb6   :  { %v48_v17 = vmul.f32 %v47_v14, %v44_v15 }
  0xb8   :  { %v49_v18 = vadd.f32 %v48_v17, %v46_v16 }
  0xba   :  { %v50_v19 = vmul.f32 0.5, %v49_v18 }
  0xbc   :  { %v59_v20 = vsel %vm58_vm3, %v50_v19, 0.0 }
  0xbd   :  { %60 = vadd.xlane.f32.xlu0 %v59_v20 }
 0x146   :  { %v61_v21 = vpop.xlane.xlu0 %60 }
 0x147   :  { %v62_v22 = vrot.slane %v61_v21, 4 }
 0x149   :  { %v63_v23 = vadd.f32 %v62_v22, %v61_v21 }
 0x14b   :  { %v64_v24 = vrot.slane %v63_v23, 2 }
 0x14d   :  { %v65_v25 = vadd.f32 %v64_v24, %v63_v23 }
 0x14f   :  { %v66_v26 = vrot.slane %v65_v25, 1 }
 0x151   :  { %v67_v27 = vadd.f32 %v66_v26, %v65_v25 }
 0x153   :  { %87 = vpush %v67_v27 }
 0x184   :  { %s88_s20 = spop %87 }
 0x185   :  { %v69_v28 = vstv %s88_s20 }
 0x186   :  { %71 = vst.msk [vmem:[#allocation5] sm:$0x1] %vm70_vm4, %v69_v28 }
 0x187   :  { %124 = shalt.err (!%p121_p9)
}
 0x188   :  { %81 = dma.vmem_to_hbm [thread:$0]  %s79_s2, 16, %s174_s3, [#allocation4]  }
 0x189   :  { %135 = dma.done.wait [#allocation4], 16  }
 0x18a   :  { %136 = vsyncadd [#allocation4], 4294967280 }
 0x18b   :  { %85 = vsyncpa [#allocation3], 1 }
 0x18c   :  { %86 = vsyncpa [#allocation4], 1 }

</bundles_post_ra>
